<compile_context>
chip_gen: v7x
topology: tpu7x:2x2x1
jax: 0.10.0
libtpu: 0.0.40
codegen_flags: <defaults>
</compile_context>

<pallas_src>
import functools

import jax
import jax.numpy as jnp
from jax.experimental import pallas as pl
from jax.experimental.pallas import tpu as pltpu

LANE = 128


def _round_up(n, m):
    return ((n + m - 1) // m) * m


def _make_mlp_kernel(num_stacked, out_features):
    """num_stacked = number of weight slabs in the stacked (num_stacked, P, P) array:
    hidden layers 1..n-1 followed by the output layer."""

    def kernel(x_ref, w0_ref, wh_ref, b_ref, o_ref):
        b = b_ref[...]  # (num_stacked + 1, P) f32, tiny, load once

        # input layer + ReLU  (MXU matmul, f32 accumulation)
        h = jnp.dot(x_ref[...], w0_ref[...], preferred_element_type=jnp.float32)
        h = jnp.maximum(h + b[0:1, :], 0.0)

        # hidden layers + ReLU (dropout p=0.0 -> identity)
        for i in range(num_stacked - 1):
            h = jnp.dot(h.astype(wh_ref.dtype), wh_ref[i],
                        preferred_element_type=jnp.float32)
            h = jnp.maximum(h + b[i + 1:i + 2, :], 0.0)

        # output layer (no activation); padded bias lanes are exact zeros
        out = jnp.dot(h.astype(wh_ref.dtype), wh_ref[num_stacked - 1],
                      preferred_element_type=jnp.float32)
        out = out + b[num_stacked:num_stacked + 1, :]

        # store only the true output width (narrow masked stores, no padded writeback)
        o_ref[...] = out[:, :out_features].astype(o_ref.dtype)

    return kernel


def _pack_params(params, in_features, widths, dtype):
    """Zero-pad every layer width to a common 128-lane multiple P.
    Returns:
      w0_p : (in_features, P)         first layer weight (compute dtype)
      wh   : (L-1, P, P)              stacked hidden + output weights (compute dtype)
      bs   : (L, P)                   stacked biases (f32; bias-add stays in f32)
    Zero padding guarantees padded lanes contribute exactly 0 to every dot product.
    """
    P = _round_up(max(widths), LANE)
    L = len(params)

    w0, _ = params[0]
    w0_p = jnp.zeros((in_features, P), dtype).at[:, : w0.shape[1]].set(w0.astype(dtype))

    wh = jnp.zeros((L - 1, P, P), dtype)
    for i, (w, _) in enumerate(params[1:]):
        wh = wh.at[i, : w.shape[0], : w.shape[1]].set(w.astype(dtype))

    bs = jnp.zeros((L, P), jnp.float32)
    for i, (_, b) in enumerate(params):
        bs = bs.at[i, : b.shape[-1]].set(b.reshape(-1).astype(jnp.float32))

    return w0_p, wh, bs, P


@functools.partial(jax.jit, static_argnames=("out_features", "block_b", "use_bf16"))
def mlp_forward(x, params, out_features, *, block_b=8192, use_bf16=True):
    """x: (B, in_features) float32. params: list of (W, b) with W in (in, out) layout."""
    B, in_features = x.shape
    widths = [w.shape[1] for (w, _) in params]

    compute_dtype = jnp.bfloat16 if use_bf16 else jnp.float32
    x = x.astype(compute_dtype)
    w0_p, wh, bs, P = _pack_params(params, in_features, widths, compute_dtype)
    num_stacked = wh.shape[0]

    # Batch tile: multiple of 8 sublanes; large enough to amortize per-step overhead.
    # For 2048 <= B <= block_b, split into 2 tiles so the "parallel" grid axis gives
    # the second v7x TensorCore something to do.
    if B <= block_b:
        TB = B
        if B >= 2048:
            half = _round_up((B + 1) // 2, 8)
            if half < B:
                TB = half
    else:
        TB = block_b
    grid = (pl.cdiv(B, TB),)

    itemsize = x.dtype.itemsize
    flops = 2 * B * (in_features * P + num_stacked * P * P)
    bytes_accessed = (itemsize * (x.size + w0_p.size + wh.size)
                      + 4 * bs.size + 4 * B * out_features)

    return pl.pallas_call(
        _make_mlp_kernel(num_stacked, out_features),
        out_shape=jax.ShapeDtypeStruct((B, out_features), jnp.float32),
        grid=grid,
        in_specs=[
            # activations: tiled over the batch axis (double-buffered by Pallas)
            pl.BlockSpec((TB, in_features), lambda i: (i, 0)),
            # weights / biases: constant index map -> fetched once, VMEM-resident
            pl.BlockSpec((in_features, P), lambda i: (0, 0)),
            pl.BlockSpec((num_stacked, P, P), lambda i: (0, 0, 0)),
            pl.BlockSpec((num_stacked + 1, P), lambda i: (0, 0)),
        ],
        # true-width output: no padded writeback, no wrapper-side slice pass
        out_specs=pl.BlockSpec((TB, out_features), lambda i: (i, 0)),
        compiler_params=pltpu.CompilerParams(
            dimension_semantics=("parallel",),
        ),
        cost_estimate=pl.CostEstimate(
            flops=flops, transcendentals=0, bytes_accessed=bytes_accessed
        ),
    )(x, w0_p, wh, bs)


def init_linear(key, fan_in, fan_out):
    """PyTorch-style init: U(-1/sqrt(fan_in), 1/sqrt(fan_in)). W in (in, out) layout."""
    kw, kb = jax.random.split(key)
    bound = 1.0 / (fan_in ** 0.5)
    w = jax.random.uniform(kw, (fan_in, fan_out), jnp.float32, -bound, bound)
    b = jax.random.uniform(kb, (1, fan_out), jnp.float32, -bound, bound)
    return w, b


if __name__ == "__main__":
    key = jax.random.PRNGKey(0)

    # Small, module-consistent shapes.
    batch = 8
    in_features = 32
    out_features = 4
    hidden_size = [64, 16, 64]  # module default

    keys = jax.random.split(key, 5)
    dims = [in_features] + hidden_size + [out_features]
    params = [init_linear(keys[i], dims[i], dims[i + 1]) for i in range(4)]

    x = jax.random.normal(keys[4], (batch, in_features), jnp.float32)

    # Pure-JAX reference (same math, unpadded, f32).
    ref = x
    for i, (w, b) in enumerate(params):
        ref = ref @ w + b
        if i < len(params) - 1:
            ref = jnp.maximum(ref, 0.0)

    # f32 path: exactness check.
    y32 = jax.block_until_ready(mlp_forward(x, params, out_features, use_bf16=False))
    # bf16 path (default): performance path, looser tolerance (inputs/weights quantized).
    y16 = jax.block_until_ready(mlp_forward(x, params, out_features, use_bf16=True))

    assert y32.shape == (batch, out_features)
    assert y16.shape == (batch, out_features)
    assert jnp.allclose(y32, ref, atol=1e-4, rtol=1e-4)
    assert jnp.allclose(y16, ref, atol=3e-2, rtol=3e-2)

    print("KERNEL_OK")
</pallas_src>

<mosaic_0001>
module attributes {stable_mosaic.version = 11 : i64} {
  func.func @kernel(%arg0: i32, %arg1: memref<8x32xf32, #tpu.memory_space<vmem>>, %arg2: memref<32x128xf32, #tpu.memory_space<vmem>>, %arg3: memref<3x128x128xf32, #tpu.memory_space<vmem>>, %arg4: memref<4x128xf32, #tpu.memory_space<vmem>>, %arg5: memref<8x4xf32, #tpu.memory_space<vmem>>) attributes {dimension_semantics = [#tpu.dimension_semantics<parallel>], iteration_bounds = array<i64: 1>, scalar_prefetch = 0 : i64, scratch_operands = 0 : i64, tpu.core_type = #tpu.core_type<tc>, window_params = [{transform_indices = @transform_0, window_bounds = array<i64: 8, 32>}, {pipeline_mode = #tpu.pipeline_mode<synchronous>, transform_indices = @transform_1, window_bounds = array<i64: 32, 128>}, {pipeline_mode = #tpu.pipeline_mode<synchronous>, transform_indices = @transform_2, window_bounds = array<i64: 3, 128, 128>}, {pipeline_mode = #tpu.pipeline_mode<synchronous>, transform_indices = @transform_3, window_bounds = array<i64: 4, 128>}, {transform_indices = @transform_4, window_bounds = array<i64: 8, 4>}]} {
    %c0 = arith.constant 0 : index
    %c0_0 = arith.constant 0 : index
    %0 = vector.load %arg4[%c0, %c0_0] : memref<4x128xf32, #tpu.memory_space<vmem>>, vector<4x128xf32>
    %c0_1 = arith.constant 0 : index
    %c0_2 = arith.constant 0 : index
    %1 = vector.load %arg1[%c0_1, %c0_2] : memref<8x32xf32, #tpu.memory_space<vmem>>, vector<8x32xf32>
    %c0_3 = arith.constant 0 : index
    %c0_4 = arith.constant 0 : index
    %2 = vector.load %arg2[%c0_3, %c0_4] : memref<32x128xf32, #tpu.memory_space<vmem>>, vector<32x128xf32>
    %cst = arith.constant dense<0.000000e+00> : vector<8x128xf32>
    %3 = tpu.matmul %1, %2, %cst {dimension_numbers = #tpu.dot_dimension_numbers<[1], [0], [0], [1], [0, 0, 1, 1], [], []>} : vector<8x32xf32>, vector<32x128xf32>, vector<8x128xf32> -> vector<8x128xf32>
    %4 = vector.extract_strided_slice %0 {offsets = [0, 0], sizes = [1, 128], strides = [1, 1]} : vector<4x128xf32> to vector<1x128xf32>
    %5 = vector.broadcast %4 : vector<1x128xf32> to vector<8x128xf32>
    %6 = arith.addf %3, %5 : vector<8x128xf32>
    %cst_5 = arith.constant 0.000000e+00 : f32
    %7 = vector.broadcast %cst_5 : f32 to vector<8x128xf32>
    %8 = arith.maximumf %6, %7 : vector<8x128xf32>
    %c0_6 = arith.constant 0 : index
    %c0_7 = arith.constant 0 : index
    %c0_8 = arith.constant 0 : index
    %9 = vector.load %arg3[%c0_6, %c0_7, %c0_8] : memref<3x128x128xf32, #tpu.memory_space<vmem>>, vector<1x128x128xf32>
    %10 = vector.shape_cast %9 : vector<1x128x128xf32> to vector<128x128xf32>
    %cst_9 = arith.constant dense<0.000000e+00> : vector<8x128xf32>
    %11 = tpu.matmul %8, %10, %cst_9 {dimension_numbers = #tpu.dot_dimension_numbers<[1], [0], [0], [1], [0, 0, 1, 1], [], []>} : vector<8x128xf32>, vector<128x128xf32>, vector<8x128xf32> -> vector<8x128xf32>
    %12 = vector.extract_strided_slice %0 {offsets = [1, 0], sizes = [1, 128], strides = [1, 1]} : vector<4x128xf32> to vector<1x128xf32>
    %13 = vector.broadcast %12 : vector<1x128xf32> to vector<8x128xf32>
    %14 = arith.addf %11, %13 : vector<8x128xf32>
    %cst_10 = arith.constant 0.000000e+00 : f32
    %15 = vector.broadcast %cst_10 : f32 to vector<8x128xf32>
    %16 = arith.maximumf %14, %15 : vector<8x128xf32>
    %c1 = arith.constant 1 : index
    %c0_11 = arith.constant 0 : index
    %c0_12 = arith.constant 0 : index
    %17 = vector.load %arg3[%c1, %c0_11, %c0_12] : memref<3x128x128xf32, #tpu.memory_space<vmem>>, vector<1x128x128xf32>
    %18 = vector.shape_cast %17 : vector<1x128x128xf32> to vector<128x128xf32>
    %cst_13 = arith.constant dense<0.000000e+00> : vector<8x128xf32>
    %19 = tpu.matmul %16, %18, %cst_13 {dimension_numbers = #tpu.dot_dimension_numbers<[1], [0], [0], [1], [0, 0, 1, 1], [], []>} : vector<8x128xf32>, vector<128x128xf32>, vector<8x128xf32> -> vector<8x128xf32>
    %20 = vector.extract_strided_slice %0 {offsets = [2, 0], sizes = [1, 128], strides = [1, 1]} : vector<4x128xf32> to vector<1x128xf32>
    %21 = vector.broadcast %20 : vector<1x128xf32> to vector<8x128xf32>
    %22 = arith.addf %19, %21 : vector<8x128xf32>
    %cst_14 = arith.constant 0.000000e+00 : f32
    %23 = vector.broadcast %cst_14 : f32 to vector<8x128xf32>
    %24 = arith.maximumf %22, %23 : vector<8x128xf32>
    %c2 = arith.constant 2 : index
    %c0_15 = arith.constant 0 : index
    %c0_16 = arith.constant 0 : index
    %25 = vector.load %arg3[%c2, %c0_15, %c0_16] : memref<3x128x128xf32, #tpu.memory_space<vmem>>, vector<1x128x128xf32>
    %26 = vector.shape_cast %25 : vector<1x128x128xf32> to vector<128x128xf32>
    %cst_17 = arith.constant dense<0.000000e+00> : vector<8x128xf32>
    %27 = tpu.matmul %24, %26, %cst_17 {dimension_numbers = #tpu.dot_dimension_numbers<[1], [0], [0], [1], [0, 0, 1, 1], [], []>} : vector<8x128xf32>, vector<128x128xf32>, vector<8x128xf32> -> vector<8x128xf32>
    %28 = vector.extract_strided_slice %0 {offsets = [3, 0], sizes = [1, 128], strides = [1, 1]} : vector<4x128xf32> to vector<1x128xf32>
    %29 = vector.broadcast %28 : vector<1x128xf32> to vector<8x128xf32>
    %30 = arith.addf %27, %29 : vector<8x128xf32>
    %31 = vector.extract_strided_slice %30 {offsets = [0, 0], sizes = [8, 4], strides = [1, 1]} : vector<8x128xf32> to vector<8x4xf32>
    %c0_18 = arith.constant 0 : index
    %c0_19 = arith.constant 0 : index
    %32 = vector.load %arg5[%c0_18, %c0_19] : memref<8x4xf32, #tpu.memory_space<vmem>>, vector<8x4xf32>
    tpu.vector_store %arg5[%c0_18, %c0_19], %31 {strides = array<i32>} : memref<8x4xf32, #tpu.memory_space<vmem>>, vector<8x4xf32>,
    return
  }
  func.func @transform_0(%arg0: i32) -> (i32, i32) {
    %c0_i32 = arith.constant 0 : i32
    %c0_i32_0 = arith.constant 0 : i32
    return %arg0, %c0_i32 : i32, i32
  }
  func.func @transform_1(%arg0: i32) -> (i32, i32) {
    %c0_i32 = arith.constant 0 : i32
    %c0_i32_0 = arith.constant 0 : i32
    %c0_i32_1 = arith.constant 0 : i32
    return %c0_i32, %c0_i32_0 : i32, i32
  }
  func.func @transform_2(%arg0: i32) -> (i32, i32, i32) {
    %c0_i32 = arith.constant 0 : i32
    %c0_i32_0 = arith.constant 0 : i32
    %c0_i32_1 = arith.constant 0 : i32
    %c0_i32_2 = arith.constant 0 : i32
    return %c0_i32, %c0_i32_0, %c0_i32_1 : i32, i32, i32
  }
  func.func @transform_3(%arg0: i32) -> (i32, i32) {
    %c0_i32 = arith.constant 0 : i32
    %c0_i32_0 = arith.constant 0 : i32
    %c0_i32_1 = arith.constant 0 : i32
    return %c0_i32, %c0_i32_0 : i32, i32
  }
  func.func @transform_4(%arg0: i32) -> (i32, i32) {
    %c0_i32 = arith.constant 0 : i32
    %c0_i32_0 = arith.constant 0 : i32
    return %arg0, %c0_i32 : i32, i32
  }
}

</mosaic_0001>

<bundles_post_ra>
// kernel: mlp_forward.1
= control target key start
LH: loop header
LB: loop body
LE: loop exit
PB: predicated region body
PF: predicated region fallthrough
CT: control target
= control target key end

     0   :  { %v668_v0 = vmov 0.0|0.0   ;;  %vm669_vm0 = vmmov 0   ;;  %v670_v4 = vmov 0.0   ;;  %vm27_vm1 = vcmask 261120   ;;  %s907_s1 = inlined_call_operand.vmem [shape: f32[32,128], index: 1, kind: input, shape index: {}]   ;;  %s908_s2 = inlined_call_operand.vmem [shape: f32[3,128,128], index: 2, kind: input, shape index: {}]   ;;  %s909_s0 = inlined_call_operand.vmem [shape: f32[8,32], index: 0, kind: input, shape index: {}]   ;;  %s910_s3 = inlined_call_operand.vmem [shape: f32[4,128], index: 3, kind: input, shape index: {}]   ;;  %s911_s4 = inlined_call_operand.vmem [shape: f32[8,4], index: 4, kind: output, shape index: {}]  }
   0x1   :  { %587 = vmatprep.subr.bf16.mxu0 %v668_v0  ;;  %v19_v1 = vld [vmem:[%s907_s1] sm:$0xff]  ;;  %v20_v2 = vld [vmem:[%s907_s1 + $0x8] sm:$0xff]  ;;  %v21_v3 = vld [vmem:[%s907_s1 + $0x10] sm:$0xff]  ;;  %479 = vmatprep.mubr.msk.f32.mxu0 %vm669_vm0, %v670_v4  ;;  %v23_v54 = vlaneseq  ;;  %vm376_vm2 = vcmask 31744  }
   0x2   :  { %v588_v5 = vpack.c.bf16 %v20_v2, %v19_v1  ;;  %v22_v6 = vld [vmem:[%s907_s1 + $0x18] sm:$0xff]  ;;  %593 = vmatprep.subr.bf16.mxu1 %v668_v0  ;;  %v102_v7 = vld [vmem:[%s908_s2] sm:$0xff]  ;;  %514 = vmatprep.mubr.msk.f32.mxu1 %vm669_vm0, %v670_v4  ;;  %v103_v8 = vld [vmem:[%s908_s2 + $0x8] sm:$0xff] }
   0x3   :  { %v104_v9 = vld [vmem:[%s908_s2 + $0x10] sm:$0xff]  ;;  %v105_v10 = vld [vmem:[%s908_s2 + $0x18] sm:$0xff]  ;;  %v591_v11 = vpack.c.bf16 %v22_v6, %v21_v3  ;;  %v594_v12 = vpack.c.bf16 %v103_v8, %v102_v7  ;;  %v106_v14 = vld [vmem:[%s908_s2 + $0x20] sm:$0xff]  ;;  %v826_v55 = vshrl.u32 %v23_v54, 7 }
   0x4   :  { %589 = vmatpush3.bf16.msra.mxu0 %v588_v5  ;;  %v597_v13 = vpack.c.bf16 %v105_v10, %v104_v9  ;;  %v107_v15 = vld [vmem:[%s908_s2 + $0x28] sm:$0xff]  ;;  %v18_v16 = vld [vmem:[%s909_s0] sm:$0xff]  ;;  %v108_v18 = vld [vmem:[%s908_s2 + $0x30] sm:$0xff] }
   0x5   :  { %590 = vmatprep.subr.bf16.mxu0 %v668_v0  ;;  %595 = vmatpush3.bf16.msra.mxu1 %v594_v12  ;;  %v600_v17 = vpack.c.bf16 %v107_v15, %v106_v14  ;;  %v109_v19 = vld [vmem:[%s908_s2 + $0x38] sm:$0xff]  ;;  %v110_v21 = vld [vmem:[%s908_s2 + $0x40] sm:$0xff]  ;;  %v111_v22 = vld [vmem:[%s908_s2 + $0x48] sm:$0xff]  ;;  %v25_v56 = vsub.s32 0, %v826_v55 }
   0x6   :  { %596 = vmatprep.subr.bf16.mxu1 %v668_v0  ;;  %v603_v20 = vpack.c.bf16 %v109_v19, %v108_v18  ;;  %v606_v23 = vpack.c.bf16 %v111_v22, %v110_v21  ;;  %v112_v24 = vld [vmem:[%s908_s2 + $0x50] sm:$0xff]  ;;  %v113_v25 = vld [vmem:[%s908_s2 + $0x58] sm:$0xff]  ;;  %v114_v27 = vld [vmem:[%s908_s2 + $0x60] sm:$0xff] }
   0x7   :  { %v609_v26 = vpack.c.bf16 %v113_v25, %v112_v24  ;;  %v115_v28 = vld [vmem:[%s908_s2 + $0x68] sm:$0xff]  ;;  %v116_v30 = vld [vmem:[%s908_s2 + $0x70] sm:$0xff]  ;;  %v117_v31 = vld [vmem:[%s908_s2 + $0x78] sm:$0xff]  ;;  %v120_v24 = vsub.s32 1, %v826_v55 }
   0x8   :  { %592 = vmatpush3.bf16.msra.mxu0 %v591_v11  ;;  %v612_v29 = vpack.c.bf16 %v115_v28, %v114_v27  ;;  %v615_v32 = vpack.c.bf16 %v117_v31, %v116_v30  ;;  %v383_v33 = vld [vmem:[%s908_s2 + $0x80] sm:$0xff]  ;;  %v384_v34 = vld [vmem:[%s908_s2 + $0x88] sm:$0xff]  ;;  %v385_v35 = vld [vmem:[%s908_s2 + $0x90] sm:$0xff] }
   0x9   :  { %617 = vmatprep.subr.bf16.mxu0 %v668_v0  ;;  %598 = vmatpush3.bf16.msra.mxu1 %v597_v13  ;;  %v618_v36 = vpack.c.bf16 %v384_v34, %v383_v33  ;;  %v386_v37 = vld [vmem:[%s908_s2 + $0x98] sm:$0xff]  ;;  %v387_v39 = vld [vmem:[%s908_s2 + $0xa0] sm:$0xff]  ;;  %v388_v40 = vld [vmem:[%s908_s2 + $0xa8] sm:$0xff] }
   0xa   :  { %599 = vmatprep.subr.bf16.mxu1 %v668_v0  ;;  %v621_v38 = vpack.c.bf16 %v386_v37, %v385_v35  ;;  %v624_v41 = vpack.c.bf16 %v388_v40, %v387_v39  ;;  %v389_v42 = vld [vmem:[%s908_s2 + $0xb0] sm:$0xff]  ;;  %v390_v43 = vld [vmem:[%s908_s2 + $0xb8] sm:$0xff]  ;;  %v391_v45 = vld [vmem:[%s908_s2 + $0xc0] sm:$0xff] }
   0xb   :  { %480 = vmatmul.mubr.msk.f32.vlgmr.msra.gmra.mrb[0].mxu0 %vm27_vm1, %v18_v16  ;;  %v627_v44 = vpack.c.bf16 %v390_v43, %v389_v42  ;;  %v392_v46 = vld [vmem:[%s908_s2 + $0xc8] sm:$0xff]  ;;  %v393_v48 = vld [vmem:[%s908_s2 + $0xd0] sm:$0xff]  ;;  %v394_v49 = vld [vmem:[%s908_s2 + $0xd8] sm:$0xff] }
   0xc   :  { %549 = vmatprep.mubr.msk.f32.mxu0 %vm669_vm0, %v670_v4  ;;  %619 = vmatpush3.bf16.msra.mxu0 %v618_v36  ;;  %v630_v47 = vpack.c.bf16 %v392_v46, %v391_v45  ;;  %v633_v50 = vpack.c.bf16 %v394_v49, %v393_v48  ;;  %v395_v51 = vld [vmem:[%s908_s2 + $0xe0] sm:$0xff]  ;;  %v396_v52 = vld [vmem:[%s908_s2 + $0xe8] sm:$0xff]  ;;  %v397_v63 = vld [vmem:[%s908_s2 + $0xf0] sm:$0xff] }
   0xd   :  { %601 = vmatpush3.bf16.msra.mxu1 %v600_v17  ;;  %620 = vmatprep.subr.bf16.mxu0 %v668_v0  ;;  %v636_v53 = vpack.c.bf16 %v396_v52, %v395_v51  ;;  %v832_v57 = vld [vmem:[%s910_s3] sm:$0xf]  ;;  %v398_v1 = vld [vmem:[%s908_s2 + $0xf8] sm:$0xff]  ;;  %v400_v5 = vld [vmem:[%s908_s2 + $0x108] sm:$0xff] }
   0xe   :  { %602 = vmatprep.subr.bf16.mxu1 %v668_v0  ;;  %v26_v58 = vrot.slane %v832_v57, %v25_v56  ;;  %v639_v2 = vpack.c.bf16 %v398_v1, %v397_v63  ;;  %v399_v3 = vld [vmem:[%s908_s2 + $0x100] sm:$0xff]  ;;  %v402_v7 = vld [vmem:[%s908_s2 + $0x118] sm:$0xff]  ;;  %v404_v10 = vld [vmem:[%s908_s2 + $0x128] sm:$0xff]  ;;  %v121_v25 = vrot.slane %v832_v57, %v120_v24 }
   0xf   :  { %v642_v6 = vpack.c.bf16 %v400_v5, %v399_v3  ;;  %v403_v9 = vld [vmem:[%s908_s2 + $0x120] sm:$0xff]  ;;  %v405_v12 = vld [vmem:[%s908_s2 + $0x130] sm:$0xff]  ;;  %v406_v13 = vld [vmem:[%s908_s2 + $0x138] sm:$0xff] }
  0x10   :  { %622 = vmatpush3.bf16.msra.mxu0 %v621_v38  ;;  %v648_v11 = vpack.c.bf16 %v404_v10, %v403_v9  ;;  %v651_v14 = vpack.c.bf16 %v406_v13, %v405_v12  ;;  %v407_v15 = vld [vmem:[%s908_s2 + $0x140] sm:$0xff]  ;;  %v408_v16 = vld [vmem:[%s908_s2 + $0x148] sm:$0xff]  ;;  %v409_v18 = vld [vmem:[%s908_s2 + $0x150] sm:$0xff]  ;;  %v304_v38 = vsub.s32 3, %v826_v55 }
  0x11   :  { %604 = vmatpush3.bf16.msra.mxu1 %v603_v20  ;;  %623 = vmatprep.subr.bf16.mxu0 %v668_v0  ;;  %v654_v17 = vpack.c.bf16 %v408_v16, %v407_v15  ;;  %v410_v19 = vld [vmem:[%s908_s2 + $0x158] sm:$0xff]  ;;  %v411_v21 = vld [vmem:[%s908_s2 + $0x160] sm:$0xff]  ;;  %v412_v22 = vld [vmem:[%s908_s2 + $0x168] sm:$0xff] }
  0x12   :  { %605 = vmatprep.subr.bf16.mxu1 %v668_v0  ;;  %v657_v20 = vpack.c.bf16 %v410_v19, %v409_v18  ;;  %v413_v30 = vld [vmem:[%s908_s2 + $0x170] sm:$0xff]  ;;  %v414_v31 = vld [vmem:[%s908_s2 + $0x178] sm:$0xff]  ;;  %v305_v39 = vrot.slane %v832_v57, %v304_v38 }
  0x14   :  { %625 = vmatpush3.bf16.msra.mxu0 %v624_v41 }
  0x15   :  { %607 = vmatpush3.bf16.msra.mxu1 %v606_v23  ;;  %626 = vmatprep.subr.bf16.mxu0 %v668_v0  ;;  %v660_v23 = vpack.c.bf16 %v412_v22, %v411_v21 }
  0x16   :  { %608 = vmatprep.subr.bf16.mxu1 %v668_v0 }
  0x18   :  { %628 = vmatpush3.bf16.msra.mxu0 %v627_v44 }
  0x19   :  { %610 = vmatpush3.bf16.msra.mxu1 %v609_v26  ;;  %629 = vmatprep.subr.bf16.mxu0 %v668_v0 }
  0x1a   :  { %611 = vmatprep.subr.bf16.mxu1 %v668_v0 }
  0x1c   :  { %631 = vmatpush3.bf16.msra.mxu0 %v630_v47 }
  0x1d   :  { %613 = vmatpush3.bf16.msra.mxu1 %v612_v29  ;;  %632 = vmatprep.subr.bf16.mxu0 %v668_v0 }
  0x1e   :  { %614 = vmatprep.subr.bf16.mxu1 %v668_v0 }
  0x20   :  { %634 = vmatpush3.bf16.msra.mxu0 %v633_v50 }
  0x21   :  { %616 = vmatpush3.bf16.msra.mxu1 %v615_v32  ;;  %635 = vmatprep.subr.bf16.mxu0 %v668_v0  ;;  %v663_v32 = vpack.c.bf16 %v414_v31, %v413_v30 }
  0x22   :  { %641 = vmatprep.subr.bf16.mxu1 %v668_v0 }
  0x24   :  { %637 = vmatpush3.bf16.msra.mxu0 %v636_v53 }
  0x25   :  { %638 = vmatprep.subr.bf16.mxu0 %v668_v0 }
  0x28   :  { %640 = vmatpush3.bf16.msra.mxu0 %v639_v2 }
  0xde   :  { %v97_v59 = vpop.f32.mrb[0].mxu0 }
  0xdf   :  { %v98_v60 = vadd.f32 %v97_v59, %v26_v58  ;;  %v481_v61 = vpop.f32.mrb[1].mxu0 }
  0xe1   :  { %v101_v62 = vmax.f32 %v98_v60, 0.0 }
  0xe3   :  { %515 = vmatmul.mubr.f32.vlgmr.msra.gmra.mrb[0].mxu1 %v101_v62 }
  0xe4   :  { %584 = vmatprep.mubr.msk.f32.mxu1 %vm669_vm0, %v670_v4  ;;  %v401_v4 = vld [vmem:[%s908_s2 + $0x110] sm:$0xff]  ;;  %643 = vmatpush3.bf16.msra.mxu1 %v642_v6 }
  0xe5   :  { %v645_v8 = vpack.c.bf16 %v402_v7, %v401_v4  ;;  %644 = vmatprep.subr.bf16.mxu1 %v668_v0 }
  0xe8   :  { %646 = vmatpush3.bf16.msra.mxu1 %v645_v8 }
  0xe9   :  { %647 = vmatprep.subr.bf16.mxu1 %v668_v0 }
  0xec   :  { %649 = vmatpush3.bf16.msra.mxu1 %v648_v11 }
  0xed   :  { %650 = vmatprep.subr.bf16.mxu1 %v668_v0 }
  0xf0   :  { %652 = vmatpush3.bf16.msra.mxu1 %v651_v14 }
  0xf1   :  { %653 = vmatprep.subr.bf16.mxu1 %v668_v0 }
  0xf4   :  { %655 = vmatpush3.bf16.msra.mxu1 %v654_v17 }
  0xf5   :  { %656 = vmatprep.subr.bf16.mxu1 %v668_v0 }
  0xf8   :  { %658 = vmatpush3.bf16.msra.mxu1 %v657_v20 }
  0xf9   :  { %659 = vmatprep.subr.bf16.mxu1 %v668_v0 }
  0xfc   :  { %661 = vmatpush3.bf16.msra.mxu1 %v660_v23 }
  0xfd   :  { %662 = vmatprep.subr.bf16.mxu1 %v668_v0  ;;  %v212_v0 = vsub.s32 2, %v826_v55 }
  0xff   :  { %v213_v33 = vrot.slane %v832_v57, %v212_v0 }
 0x100   :  { %664 = vmatpush3.bf16.msra.mxu1 %v663_v32 }
 0x1b6   :  { %v188_v26 = vpop.f32.mrb[0].mxu1 }
 0x1b7   :  { %v189_v27 = vadd.f32 %v188_v26, %v121_v25  ;;  %v516_v28 = vpop.f32.mrb[1].mxu1 }
 0x1b9   :  { %v192_v29 = vmax.f32 %v189_v27, 0.0 }
 0x1bb   :  { %550 = vmatmul.mubr.f32.vlgmr.msra.gmra.mrb[2].mxu0 %v192_v29 }
 0x28e   :  { %v280_v34 = vpop.f32.mrb[2].mxu0 }
 0x28f   :  { %v281_v35 = vadd.f32 %v280_v34, %v213_v33  ;;  %v551_v36 = vpop.f32.mrb[3].mxu0 }
 0x291   :  { %v284_v37 = vmax.f32 %v281_v35, 0.0 }
 0x293   :  { %585 = vmatmul.mubr.f32.vlgmr.msra.gmra.mrb[2].mxu1 %v284_v37 }
 0x366   :  { %v372_v40 = vpop.f32.mrb[2].mxu1 }
 0x367   :  { %v373_v41 = vadd.f32 %v372_v40, %v305_v39  ;;  %v586_v42 = vpop.f32.mrb[3].mxu1 }
 0x369   :  { %377 = vst.msk [vmem:[%s911_s4] sm:$0xff] %vm376_vm2, %v373_v41 }

</bundles_post_ra>
